<compile_context>
chip_gen: v7x
topology: tpu7x:2x2x1
jax: 0.10.0
libtpu: 0.0.40
codegen_flags: <defaults>
</compile_context>

<pallas_src>
import functools

import jax
import jax.numpy as jnp
from jax.experimental import pallas as pl
from jax.experimental.pallas import tpu as pltpu


def _round_up(x, m):
    return ((x + m - 1) // m) * m


# ----------------------------------------------------------------------------
# Generic row-tiled linear (+ optional ReLU) kernel
# ----------------------------------------------------------------------------
def _linear_act_kernel(x_ref, w_ref, b_ref, o_ref, *, act):
    y = jnp.dot(x_ref[...], w_ref[...],
                preferred_element_type=jnp.float32) + b_ref[...]
    if act == "relu":
        y = jnp.maximum(y, 0.0)
    o_ref[...] = y


def pallas_linear(x, w_t, b, act="none", block_rows=256):
    """x (M, K) @ w_t (K, N) + b -> (M, N), row-tiled grid, weight resident."""
    M, K = x.shape
    N = w_t.shape[1]
    TM = min(block_rows, _round_up(M, 8))
    Mp = _round_up(M, TM)
    if Mp != M:
        x = jnp.pad(x, ((0, Mp - M), (0, 0)))
    out = pl.pallas_call(
        functools.partial(_linear_act_kernel, act=act),
        out_shape=jax.ShapeDtypeStruct((Mp, N), jnp.float32),
        grid_spec=pltpu.PrefetchScalarGridSpec(
            num_scalar_prefetch=0,
            grid=(Mp // TM,),
            in_specs=[pl.BlockSpec((TM, K), lambda i: (i, 0)),
                      pl.BlockSpec((K, N), lambda i: (0, 0)),
                      pl.BlockSpec((1, N), lambda i: (0, 0))],
            out_specs=pl.BlockSpec((TM, N), lambda i: (i, 0)),
        ),
        compiler_params=pltpu.CompilerParams(dimension_semantics=("parallel",)),
    )(x.astype(jnp.float32), w_t.astype(jnp.float32),
      b.reshape(1, N).astype(jnp.float32))
    return out[:M]


# ----------------------------------------------------------------------------
# Fused Conv1d + folded-BN + activation (channels-last, batch grid)
# ----------------------------------------------------------------------------
def _conv1d_act_kernel(x_ref, w_ref, b_ref, tmask_ref, o_ref, *, ksize, act):
    """x_ref: (1, Tp + 2P, Cin) pre-padded (halo + alignment); out: (1, Tp, Cout)."""
    tp = o_ref.shape[1]
    cout = o_ref.shape[2]
    x = x_ref[0]                                           # (Tp + 2P, Cin)
    w = w_ref[...]                                         # (K, Cin, Cout)
    acc = jnp.zeros((tp, cout), jnp.float32)
    for k in range(ksize):                                 # static unroll over taps
        acc = acc + jnp.dot(x[k:k + tp, :], w[k],
                            preferred_element_type=jnp.float32)
    y = acc + b_ref[...]
    if act == "relu":
        y = jnp.maximum(y, 0.0)
    elif act == "tanh":
        y = jnp.tanh(y)
    o_ref[0] = y * tmask_ref[...]                          # zero alignment tail


def pallas_conv1d_bn_act(x, w_kio, bias, tmask, act):
    """x: (B, Tp, Cin) alignment-padded & tail-zeroed -> (B, Tp, Cout) same."""
    B, Tp, Cin = x.shape
    K, _, Cout = w_kio.shape
    P = (K - 1) // 2
    xp = jnp.pad(x, ((0, 0), (P, P), (0, 0)))              # halo pad once, in XLA
    return pl.pallas_call(
        functools.partial(_conv1d_act_kernel, ksize=K, act=act),
        out_shape=jax.ShapeDtypeStruct((B, Tp, Cout), jnp.float32),
        grid_spec=pltpu.PrefetchScalarGridSpec(
            num_scalar_prefetch=0,
            grid=(B,),
            in_specs=[pl.BlockSpec((1, Tp + 2 * P, Cin), lambda b: (b, 0, 0)),
                      pl.BlockSpec((K, Cin, Cout), lambda b: (0, 0, 0)),
                      pl.BlockSpec((1, Cout), lambda b: (0, 0)),
                      pl.BlockSpec((Tp, 1), lambda b: (0, 0))],
            out_specs=pl.BlockSpec((1, Tp, Cout), lambda b: (b, 0, 0)),
        ),
        compiler_params=pltpu.CompilerParams(dimension_semantics=("parallel",)),
    )(xp.astype(jnp.float32), w_kio.astype(jnp.float32),
      bias.reshape(1, Cout).astype(jnp.float32), tmask.astype(jnp.float32))


# ----------------------------------------------------------------------------
# Encoder BiLSTM: both directions folded into one time step, time chunked
# ----------------------------------------------------------------------------
def _bilstm_chunk_kernel(xf_ref, xb_ref, v_ref,
                         wxf_ref, whf_ref, bf_ref, wxb_ref, whb_ref, bb_ref,
                         out_ref, hf, cf, hb, cb, *, hidden, chunk):
    t = pl.program_id(0)

    @pl.when(t == 0)
    def _():
        hf[...] = jnp.zeros_like(hf)
        cf[...] = jnp.zeros_like(cf)
        hb[...] = jnp.zeros_like(hb)
        cb[...] = jnp.zeros_like(cb)

    H = hidden

    def cell(x_bf16, h_ref, c_ref, wx_ref, wh_ref, b_ref):
        g = (jnp.dot(x_bf16, wx_ref[...], preferred_element_type=jnp.float32)
             + jnp.dot(h_ref[...].astype(jnp.bfloat16), wh_ref[...],
                       preferred_element_type=jnp.float32)
             + b_ref[...])
        i = jax.nn.sigmoid(g[:, :H])
        f = jax.nn.sigmoid(g[:, H:2 * H])
        gg = jnp.tanh(g[:, 2 * H:3 * H])
        o = jax.nn.sigmoid(g[:, 3 * H:4 * H])
        c_new = f * c_ref[...] + i * gg
        h_new = o * jnp.tanh(c_new)
        return h_new, c_new

    for s in range(chunk):                                 # static unroll
        m = v_ref[s]                                       # (B, 1) in {0, 1}
        hfn, cfn = cell(xf_ref[s], hf, cf, wxf_ref, whf_ref, bf_ref)
        hbn, cbn = cell(xb_ref[s], hb, cb, wxb_ref, whb_ref, bb_ref)
        hf[...] = m * hfn + (1.0 - m) * hf[...]            # freeze on pad
        cf[...] = m * cfn + (1.0 - m) * cf[...]
        hb[...] = m * hbn + (1.0 - m) * hb[...]
        cb[...] = m * cbn + (1.0 - m) * cb[...]
        out_ref[s] = jnp.concatenate([m * hfn, m * hbn], axis=1)   # pad -> 0


def pallas_bilstm(xf, xb, valid, wxf, whf, bfb, wxb, whb, bbb, *, hidden,
                  chunk=4):
    """xf/xb: (T, B, C) fwd / per-seq-reversed inputs -> (T, B, 2H)."""
    T, B, C = xf.shape
    Bp = _round_up(B, 8)
    Tp = _round_up(T, chunk)
    if Bp != B:
        pb = Bp - B
        xf = jnp.pad(xf, ((0, 0), (0, pb), (0, 0)))
        xb = jnp.pad(xb, ((0, 0), (0, pb), (0, 0)))
        valid = jnp.pad(valid, ((0, 0), (0, pb), (0, 0)))
    if Tp != T:
        pt = Tp - T
        xf = jnp.pad(xf, ((0, pt), (0, 0), (0, 0)))
        xb = jnp.pad(xb, ((0, pt), (0, 0), (0, 0)))
        valid = jnp.pad(valid, ((0, pt), (0, 0), (0, 0)))

    def resident(arr):
        nd = arr.ndim
        return pl.BlockSpec(arr.shape, lambda t, _n=nd: (0,) * _n)

    out = pl.pallas_call(
        functools.partial(_bilstm_chunk_kernel, hidden=hidden, chunk=chunk),
        out_shape=jax.ShapeDtypeStruct((Tp, Bp, 2 * hidden), jnp.float32),
        grid_spec=pltpu.PrefetchScalarGridSpec(
            num_scalar_prefetch=0,
            grid=(Tp // chunk,),
            in_specs=[pl.BlockSpec((chunk, Bp, C), lambda t: (t, 0, 0)),
                      pl.BlockSpec((chunk, Bp, C), lambda t: (t, 0, 0)),
                      pl.BlockSpec((chunk, Bp, 1), lambda t: (t, 0, 0)),
                      resident(wxf), resident(whf), resident(bfb),
                      resident(wxb), resident(whb), resident(bbb)],
            out_specs=pl.BlockSpec((chunk, Bp, 2 * hidden), lambda t: (t, 0, 0)),
            scratch_shapes=[pltpu.VMEM((Bp, hidden), jnp.float32)] * 4,
        ),
        compiler_params=pltpu.CompilerParams(
            dimension_semantics=("arbitrary",),
            vmem_limit_bytes=32 * 1024 * 1024),
    )(xf.astype(jnp.bfloat16), xb.astype(jnp.bfloat16),
      valid.astype(jnp.float32), wxf, whf, bfb, wxb, whb, bbb)
    return out[:T, :B]


# ----------------------------------------------------------------------------
# Fused autoregressive decoder, CHUNK teacher-forcing steps per grid iteration
# ----------------------------------------------------------------------------
def _decoder_chunk_kernel(pre_ref, enc_ref, encp_ref, mask_ref, ainit_ref,
                          locw_ref, wdec_ref, wvec_ref, wb_ref,
                          l0wc_ref, l0wp_ref, l0wh_ref, l0b_ref,
                          l1wx_ref, l1wh_ref, l1b_ref,
                          fpwh_ref, fpwc_ref, fpb_ref,
                          y_ref, attw_ref,
                          h0, c0, h1, c1, cum,
                          *, dh, zoneout, chunk):
    t = pl.program_id(0)

    @pl.when(t == 0)
    def _():
        h0[...] = jnp.zeros_like(h0)
        c0[...] = jnp.zeros_like(c0)
        h1[...] = jnp.zeros_like(h1)
        c1[...] = jnp.zeros_like(c1)
        cum[...] = jnp.zeros_like(cum)

    B, T = cum.shape
    K, AH = locw_ref.shape
    P = (K - 1) // 2
    zo = jnp.float32(zoneout)

    # Hoisted (per grid iteration) loads / broadcasts
    mask = mask_ref[...]
    enc = enc_ref[...]                                     # (B, T, Denc) bf16
    encp = encp_ref[...].astype(jnp.float32)               # (B, T, AH)
    locw = locw_ref[...]                                   # (K, AH) f32
    wvec_b = wvec_ref[...].reshape(1, 1, AH)
    wb = wb_ref[...]                                       # (1, 1)
    l0b = l0b_ref[...]
    l1b = l1b_ref[...]
    fpb = fpb_ref[...]
    zpad = jnp.zeros((B, P), jnp.float32)

    def lstm_gates(g, c_ref):
        i = jax.nn.sigmoid(g[:, :dh])
        f = jax.nn.sigmoid(g[:, dh:2 * dh])
        gg = jnp.tanh(g[:, 2 * dh:3 * dh])
        o = jax.nn.sigmoid(g[:, 3 * dh:4 * dh])
        c_new = f * c_ref[...] + i * gg
        h_new = o * jnp.tanh(c_new)
        return h_new, c_new

    for s in range(chunk):                                 # static unroll
        # ---- location-sensitive attention (uses previous-step h0) ----
        if s == 0:
            first = (t == 0).astype(jnp.float32)
            att_prev = ainit_ref[...] * first + cum[...] * (1.0 - first)
        else:
            att_prev = cum[...]
        # folded (U o F) location conv as a single MXU matmul
        att_pad = jnp.concatenate([zpad, att_prev, zpad], axis=1)    # (B, T+2P)
        loc_in = jnp.stack([att_pad[:, k:k + T] for k in range(K)],
                           axis=-1)                                   # (B, T, K)
        att_u = jnp.dot(loc_in.reshape(B * T, K), locw,
                        preferred_element_type=jnp.float32).reshape(B, T, AH)
        dec_proj = jnp.dot(h0[...].astype(jnp.bfloat16), wdec_ref[...],
                           preferred_element_type=jnp.float32)        # (B, AH)
        xatt = jnp.tanh(att_u + encp + dec_proj[:, None, :])
        e = jnp.sum(xatt * wvec_b, axis=-1) + wb                      # (B, T)
        e = jnp.where(mask > 0.5, -1e30, e)                           # masked_fill
        mx = jnp.max(e, axis=-1, keepdims=True)
        pexp = jnp.exp(e - mx)
        attw = pexp * pl.reciprocal(jnp.sum(pexp, axis=-1, keepdims=True),
                                    approx=True)                      # softmax
        ctx = jnp.einsum('bqt,btd->bqd',
                         attw.astype(jnp.bfloat16)[:, None, :], enc,
                         preferred_element_type=jnp.float32)[:, 0, :]  # (B, Denc)
        cum[...] = cum[...] + attw                                    # cumulative

        # ---- 2-layer ZoneOut-LSTM stack (split-weight matmuls, no concat) ----
        pre = pre_ref[s]                                              # (B, PH)
        g0 = (jnp.dot(ctx.astype(jnp.bfloat16), l0wc_ref[...],
                      preferred_element_type=jnp.float32)
              + jnp.dot(pre.astype(jnp.bfloat16), l0wp_ref[...],
                        preferred_element_type=jnp.float32)
              + jnp.dot(h0[...].astype(jnp.bfloat16), l0wh_ref[...],
                        preferred_element_type=jnp.float32)
              + l0b)
        h0n, c0n = lstm_gates(g0, c0)
        h0z = zo * h0[...] + (1.0 - zo) * h0n
        c0[...] = zo * c0[...] + (1.0 - zo) * c0n
        h0[...] = h0z

        g1 = (jnp.dot(h0z.astype(jnp.bfloat16), l1wx_ref[...],
                      preferred_element_type=jnp.float32)
              + jnp.dot(h1[...].astype(jnp.bfloat16), l1wh_ref[...],
                        preferred_element_type=jnp.float32)
              + l1b)
        h1n, c1n = lstm_gates(g1, c1)
        h1z = zo * h1[...] + (1.0 - zo) * h1n
        c1[...] = zo * c1[...] + (1.0 - zo) * c1n
        h1[...] = h1z

        # ---- fused feat_out / prob_out (single lane-dense store) ----
        y = (jnp.dot(h1z.astype(jnp.bfloat16), fpwh_ref[...],
                     preferred_element_type=jnp.float32)
             + jnp.dot(ctx.astype(jnp.bfloat16), fpwc_ref[...],
                       preferred_element_type=jnp.float32)
             + fpb)
        y_ref[s] = y
        attw_ref[s] = attw


def pallas_decoder_steps(pre_all, enc, enc_proc, pad_mask, att_init, kp,
                         *, dh, zoneout, od_r, r, chunk=4):
    S, B, PH = pre_all.shape
    T_enc = pad_mask.shape[1]
    Bp = _round_up(B, 8)
    Sp = _round_up(S, chunk)
    if Bp != B:
        pb = Bp - B
        pre_all = jnp.pad(pre_all, ((0, 0), (0, pb), (0, 0)))
        enc = jnp.pad(enc, ((0, pb), (0, 0), (0, 0)))
        enc_proc = jnp.pad(enc_proc, ((0, pb), (0, 0), (0, 0)))
        pad_mask = jnp.pad(pad_mask, ((0, pb), (0, 0)))   # pad rows run garbage math; sliced off
        att_init = jnp.pad(att_init, ((0, pb), (0, 0)))
    if Sp != S:
        pre_all = jnp.pad(pre_all, ((0, Sp - S), (0, 0), (0, 0)))

    def resident(arr):
        nd = arr.ndim
        return pl.BlockSpec(arr.shape, lambda t, _n=nd: (0,) * _n)

    enc_b = enc.astype(jnp.bfloat16)
    encp_b = enc_proc.astype(jnp.bfloat16)
    weights = [kp["locw"], kp["wdec"], kp["wvec"], kp["wb"],
               kp["l0wc"], kp["l0wp"], kp["l0wh"], kp["l0b"],
               kp["l1wx"], kp["l1wh"], kp["l1b"],
               kp["fpwh"], kp["fpwc"], kp["fpb"]]
    in_specs = ([pl.BlockSpec((chunk, Bp, PH), lambda t: (t, 0, 0)),
                 resident(enc_b), resident(encp_b),
                 resident(pad_mask), resident(att_init)]
                + [resident(w) for w in weights])
    out_specs = [pl.BlockSpec((chunk, Bp, od_r + r), lambda t: (t, 0, 0)),
                 pl.BlockSpec((chunk, Bp, T_enc), lambda t: (t, 0, 0))]
    out_shape = (jax.ShapeDtypeStruct((Sp, Bp, od_r + r), jnp.float32),
                 jax.ShapeDtypeStruct((Sp, Bp, T_enc), jnp.float32))

    y_steps, attw_steps = pl.pallas_call(
        functools.partial(_decoder_chunk_kernel, dh=dh, zoneout=zoneout,
                          chunk=chunk),
        out_shape=out_shape,
        grid_spec=pltpu.PrefetchScalarGridSpec(
            num_scalar_prefetch=0,
            grid=(Sp // chunk,),
            in_specs=in_specs,
            out_specs=out_specs,
            scratch_shapes=[pltpu.VMEM((Bp, dh), jnp.float32)] * 4
                           + [pltpu.VMEM((Bp, T_enc), jnp.float32)],
        ),
        compiler_params=pltpu.CompilerParams(
            dimension_semantics=("arbitrary",),
            vmem_limit_bytes=32 * 1024 * 1024),
    )(pre_all.astype(jnp.float32), enc_b, encp_b,
      pad_mask.astype(jnp.float32), att_init.astype(jnp.float32), *weights)
    return y_steps[:S, :B], attw_steps[:S, :B]


# ----------------------------------------------------------------------------
# Parameter prep helpers (BN folding, weight re-layout / splitting)
# ----------------------------------------------------------------------------
def fold_bn_conv(conv, eps=1e-5):
    """Fold eval-mode BatchNorm1d into the preceding (bias-free) Conv1d."""
    W = conv["weight"]                                    # (Cout, Cin, K)
    bn = conv["bn"]
    scale = bn["weight"] / jnp.sqrt(bn["running_var"] + eps)
    w_fold = W * scale[:, None, None]
    b_fold = bn["bias"] - bn["running_mean"] * scale
    return jnp.transpose(w_fold, (2, 1, 0)), b_fold       # (K, Cin, Cout), (Cout,)


def _prep_decoder_kernel_params(p, cfg):
    att = p["att"]
    r = cfg["reduction_factor"]
    OD = cfg["decoder_out_dim"]
    DH = cfg["decoder_hidden_dim"]
    ENC = cfg["encoder_hidden_dim"]
    bf16 = jnp.bfloat16
    f32 = jnp.float32
    # Fold the bias-free location conv F into the bias-free U projection.
    locw = (att["U_weight"] @ att["loc_conv_weight"][:, 0, :]).T      # (K, AH)
    l0w_ih = p["lstm"][0]["w_ih"].T                                   # (ENC+PH, 4DH)
    fp = jnp.concatenate([p["feat_out_weight"].T,
                          p["prob_out_weight"].T], axis=1)            # (DH+ENC, OD*r+r)
    return {
        "locw": locw.astype(f32),
        "wdec": att["W_weight"].T.astype(bf16),                       # (DH, AH)
        "wvec": att["w_weight"].reshape(1, -1).astype(f32),
        "wb": att["w_bias"].reshape(1, 1).astype(f32),
        "l0wc": l0w_ih[:ENC].astype(bf16),
        "l0wp": l0w_ih[ENC:].astype(bf16),
        "l0wh": p["lstm"][0]["w_hh"].T.astype(bf16),
        "l0b": (p["lstm"][0]["b_ih"] + p["lstm"][0]["b_hh"]).reshape(1, -1).astype(f32),
        "l1wx": p["lstm"][1]["w_ih"].T.astype(bf16),
        "l1wh": p["lstm"][1]["w_hh"].T.astype(bf16),
        "l1b": (p["lstm"][1]["b_ih"] + p["lstm"][1]["b_hh"]).reshape(1, -1).astype(f32),
        "fpwh": fp[:DH].astype(bf16),
        "fpwc": fp[DH:].astype(bf16),
        "fpb": jnp.concatenate([jnp.zeros((OD * r,), f32),
                                p["prob_out_bias"].astype(f32)]).reshape(1, -1),
    }


# ----------------------------------------------------------------------------
# Encoder / Decoder / Postnet forward
# ----------------------------------------------------------------------------
def encoder_forward(params, seq, in_lens):
    p = params["encoder"]
    x = p["embedding"][seq].astype(jnp.float32)            # (B, T, E), XLA gather
    B, T, _ = x.shape
    Tp = _round_up(T, 8)
    if Tp != T:
        x = jnp.pad(x, ((0, 0), (0, Tp - T), (0, 0)))      # alignment pad, once
    tmask = (jnp.arange(Tp) < T).astype(jnp.float32)[:, None]   # (Tp, 1)
    for conv in p["convs"]:
        w_kio, bias = fold_bn_conv(conv)
        x = pallas_conv1d_bn_act(x, w_kio, bias, tmask, act="relu")

    H = p["blstm_fwd"]["w_hh"].shape[1]
    valid = jnp.arange(Tp)[None, :] < in_lens[:, None]                 # (B, Tp)
    t_idx = jnp.arange(Tp)[None, :]
    rev_idx = jnp.where(t_idx < in_lens[:, None],
                        in_lens[:, None] - 1 - t_idx, t_idx)
    x_rev = jnp.take_along_axis(x, rev_idx[:, :, None], axis=1)        # per-seq reverse

    xf = jnp.transpose(x, (1, 0, 2))                                   # (Tp, B, C)
    xb = jnp.transpose(x_rev, (1, 0, 2))
    vt = jnp.transpose(valid.astype(jnp.float32), (1, 0))[:, :, None]

    def prep_dir(lp):
        wx = lp["w_ih"].T.astype(jnp.bfloat16)                         # (C, 4H)
        wh = lp["w_hh"].T.astype(jnp.bfloat16)                         # (H, 4H)
        b = (lp["b_ih"] + lp["b_hh"]).reshape(1, -1).astype(jnp.float32)
        return wx, wh, b

    wxf, whf, bfb = prep_dir(p["blstm_fwd"])
    wxb, whb, bbb = prep_dir(p["blstm_bwd"])

    out = pallas_bilstm(xf, xb, vt, wxf, whf, bfb, wxb, whb, bbb,
                        hidden=H)                                      # (Tp, B, 2H)
    out_f = jnp.transpose(out[:, :, :H], (1, 0, 2))                    # (B, Tp, H)
    out_b = jnp.take_along_axis(jnp.transpose(out[:, :, H:], (1, 0, 2)),
                                rev_idx[:, :, None], axis=1)
    out_b = jnp.where(valid[:, :, None], out_b, 0.0)
    enc = jnp.concatenate([out_f, out_b], axis=-1)                     # (B, Tp, 2H)
    return enc[:, :T, :]


def decoder_forward(params, encoder_outs, in_lens, decoder_targets):
    p = params["decoder"]
    cfg = params["config"]
    B, T_enc, D_enc = encoder_outs.shape
    OD = cfg["decoder_out_dim"]
    r = cfg["reduction_factor"]
    DH = cfg["decoder_hidden_dim"]
    PH = cfg["decoder_prenet_hidden_dim"]
    zo = float(cfg["decoder_zoneout"])
    # fused step kernel is specialised to the module defaults (2 prenet / 2 LSTM layers)
    assert len(p["lstm"]) == 2 and len(p["prenet"]) == 2

    if r > 1:
        decoder_targets = decoder_targets[:, r - 1::r]
    S = decoder_targets.shape[1]
    prev = jnp.concatenate(
        [jnp.zeros((B, 1, OD), jnp.float32),
         decoder_targets[:, :S - 1, :].astype(jnp.float32)], axis=1)   # teacher forcing
    prev = jnp.transpose(prev, (1, 0, 2))                              # (S, B, OD)

    # Prenet hoisted out of the recurrence (step-independent under teacher forcing).
    # TODO(synk): ttslearn keeps Prenet dropout active in eval; omitted (deterministic).
    pr0w, pr0b = p["prenet"][0]
    pr1w, pr1b = p["prenet"][1]
    pre = pallas_linear(prev.reshape(S * B, OD), pr0w.T, pr0b, act="relu")
    pre = pallas_linear(pre, pr1w.T, pr1b, act="relu").reshape(S, B, PH)

    pad_mask = (jnp.arange(T_enc)[None, :] >= in_lens[:, None]).astype(jnp.float32)
    att_init = (1.0 - pad_mask) / in_lens[:, None].astype(jnp.float32)

    att = p["att"]
    AH = att["V_weight"].shape[0]
    enc_proc = pallas_linear(encoder_outs.reshape(B * T_enc, D_enc),
                             att["V_weight"].T, att["V_bias"]).reshape(B, T_enc, AH)

    kp = _prep_decoder_kernel_params(p, cfg)
    y_steps, attw_steps = pallas_decoder_steps(
        pre, encoder_outs, enc_proc, pad_mask, att_init, kp,
        dh=DH, zoneout=zo, od_r=OD * r, r=r)

    out_steps = y_steps[:, :, :OD * r]                                 # (S, B, OD*r)
    logit_steps = y_steps[:, :, OD * r:]                               # (S, B, r)
    outs_time = jnp.transpose(out_steps.reshape(S, B, OD, r),
                              (1, 0, 3, 2)).reshape(B, S * r, OD)      # (B, T_dec, OD)
    logits = jnp.transpose(logit_steps, (1, 0, 2)).reshape(B, S * r)
    att_ws = jnp.transpose(attw_steps, (1, 0, 2))                      # (B, S, T_enc)
    return outs_time, logits, att_ws


def postnet_forward(params, x_time):
    layers = params["postnet"]
    n = len(layers)
    B, T, _ = x_time.shape
    Tp = _round_up(T, 8)
    y = jnp.pad(x_time, ((0, 0), (0, Tp - T), (0, 0))) if Tp != T else x_time
    tmask = (jnp.arange(Tp) < T).astype(jnp.float32)[:, None]
    for i, layer in enumerate(layers):
        w_kio, bias = fold_bn_conv(layer)
        y = pallas_conv1d_bn_act(y, w_kio, bias, tmask,
                                 act="tanh" if i != n - 1 else "none")
    return y[:, :T, :]


def tacotron2_forward(params, seq, in_lens, decoder_targets):
    encoder_outs = encoder_forward(params, seq, in_lens)
    outs, logits, att_ws = decoder_forward(params, encoder_outs, in_lens,
                                           decoder_targets)
    outs_fine = outs + postnet_forward(params, outs)
    # outs / outs_fine are already time-major == torch outs.transpose(2, 1)
    return outs, outs_fine, logits, att_ws


# ----------------------------------------------------------------------------
# Deterministic parameter init (shapes follow the PyTorch module __init__)
# ----------------------------------------------------------------------------
def init_params(key, cfg):
    key_box = [key]

    def nxt():
        key_box[0], sub = jax.random.split(key_box[0])
        return sub

    def dense(shape, scale=0.1):
        return scale * jax.random.normal(nxt(), shape, jnp.float32)

    def bn(c):
        return {"weight": 1.0 + dense((c,)),
                "bias": dense((c,)),
                "running_mean": dense((c,)),
                "running_var": 1.0 + 0.1 * jnp.abs(jax.random.normal(nxt(), (c,), jnp.float32))}

    def lstm_p(in_dim, hid):
        return {"w_ih": dense((4 * hid, in_dim)), "w_hh": dense((4 * hid, hid)),
                "b_ih": dense((4 * hid,)), "b_hh": dense((4 * hid,))}

    E, EH = cfg["embed_dim"], cfg["encoder_hidden_dim"]
    CC, CK = cfg["encoder_conv_channels"], cfg["encoder_conv_kernel_size"]
    emb = dense((cfg["num_vocab"], E)).at[0].set(0.0)            # padding_idx=0

    convs = []
    for layer in range(cfg["encoder_conv_layers"]):
        cin = E if layer == 0 else CC
        convs.append({"weight": dense((CC, cin, CK)), "bn": bn(CC)})
    encoder = {"embedding": emb, "convs": convs,
               "blstm_fwd": lstm_p(CC, EH // 2), "blstm_bwd": lstm_p(CC, EH // 2)}

    AH, AC, AK = cfg["attention_hidden_dim"], cfg["attention_conv_channels"], cfg["attention_conv_kernel_size"]
    DH, OD = cfg["decoder_hidden_dim"], cfg["decoder_out_dim"]
    PH, r = cfg["decoder_prenet_hidden_dim"], cfg["reduction_factor"]
    att = {"V_weight": dense((AH, EH)), "V_bias": dense((AH,)),
           "W_weight": dense((AH, DH)),
           "U_weight": dense((AH, AC)),
           "loc_conv_weight": dense((AC, 1, AK)),
           "w_weight": dense((1, AH)), "w_bias": dense((1,))}
    prenet = []
    for layer in range(cfg["decoder_prenet_layers"]):
        din = OD if layer == 0 else PH
        prenet.append((dense((PH, din)), dense((PH,))))
    lstm = []
    for layer in range(cfg["decoder_layers"]):
        din = EH + PH if layer == 0 else DH
        lstm.append(lstm_p(din, DH))
    decoder = {"att": att, "prenet": prenet, "lstm": lstm,
               "feat_out_weight": dense((OD * r, DH + EH)),
               "prob_out_weight": dense((r, DH + EH)),
               "prob_out_bias": dense((r,))}

    postnet = []
    PL, PC, PK = cfg["postnet_layers"], cfg["postnet_channels"], cfg["postnet_kernel_size"]
    for layer in range(PL):
        cin = OD if layer == 0 else PC
        cout = OD if layer == PL - 1 else PC
        postnet.append({"weight": dense((cout, cin, PK)), "bn": bn(cout)})

    return {"encoder": encoder, "decoder": decoder, "postnet": postnet, "config": cfg}


# ----------------------------------------------------------------------------
if __name__ == "__main__":
    cfg = dict(num_vocab=51, embed_dim=32, encoder_hidden_dim=32,
               encoder_conv_layers=2, encoder_conv_channels=32,
               encoder_conv_kernel_size=5,
               attention_hidden_dim=16, attention_conv_channels=8,
               attention_conv_kernel_size=7,
               decoder_out_dim=16, decoder_layers=2, decoder_hidden_dim=32,
               decoder_prenet_layers=2, decoder_prenet_hidden_dim=16,
               decoder_zoneout=0.1,
               postnet_layers=3, postnet_channels=32, postnet_kernel_size=5,
               reduction_factor=1)

    key = jax.random.PRNGKey(0)
    k_params, k_seq, k_tgt = jax.random.split(key, 3)
    params = init_params(k_params, cfg)

    B, T_in, T_dec = 2, 8, 6
    in_lens = jnp.array([8, 6], dtype=jnp.int32)   # sorted descending (pack_padded_sequence)
    seq = jax.random.randint(k_seq, (B, T_in), 1, cfg["num_vocab"], dtype=jnp.int32)
    seq = jnp.where(jnp.arange(T_in)[None, :] >= in_lens[:, None], 0, seq)
    decoder_targets = 0.1 * jax.random.normal(
        k_tgt, (B, T_dec, cfg["decoder_out_dim"]), jnp.float32)

    outs, outs_fine, logits, att_ws = tacotron2_forward(
        params, seq, in_lens, decoder_targets)
    jax.block_until_ready((outs, outs_fine, logits, att_ws))

    assert outs.shape == (B, T_dec, cfg["decoder_out_dim"])
    assert outs_fine.shape == (B, T_dec, cfg["decoder_out_dim"])
    assert logits.shape == (B, T_dec)
    assert att_ws.shape == (B, T_dec, T_in)
    assert all(bool(jnp.all(jnp.isfinite(x)))
               for x in (outs, outs_fine, logits, att_ws))
    print("KERNEL_OK")
</pallas_src>

<mosaic_0001>
module attributes {stable_mosaic.version = 11 : i64} {
  func.func @_conv1d_act_kernel(%arg0: i32, %arg1: memref<1x12x32xf32, #tpu.memory_space<vmem>>, %arg2: memref<5x32x32xf32, #tpu.memory_space<vmem>>, %arg3: memref<1x32xf32, #tpu.memory_space<vmem>>, %arg4: memref<8x1xf32, #tpu.memory_space<vmem>>, %arg5: memref<1x8x32xf32, #tpu.memory_space<vmem>>) attributes {dimension_semantics = [#tpu.dimension_semantics<parallel>], iteration_bounds = array<i64: 2>, scalar_prefetch = 0 : i64, scratch_operands = 0 : i64, tpu.core_type = #tpu.core_type<tc>, window_params = [{transform_indices = @transform_0, window_bounds = array<i64: 1, 12, 32>}, {pipeline_mode = #tpu.pipeline_mode<synchronous>, transform_indices = @transform_1, window_bounds = array<i64: 5, 32, 32>}, {pipeline_mode = #tpu.pipeline_mode<synchronous>, transform_indices = @transform_2, window_bounds = array<i64: 1, 32>}, {pipeline_mode = #tpu.pipeline_mode<synchronous>, transform_indices = @transform_3, window_bounds = array<i64: 8, 1>}, {transform_indices = @transform_4, window_bounds = array<i64: 1, 8, 32>}]} {
    %c0 = arith.constant 0 : index
    %c0_0 = arith.constant 0 : index
    %c0_1 = arith.constant 0 : index
    %0 = vector.load %arg1[%c0, %c0_0, %c0_1] : memref<1x12x32xf32, #tpu.memory_space<vmem>>, vector<1x12x32xf32>
    %1 = vector.shape_cast %0 : vector<1x12x32xf32> to vector<12x32xf32>
    %c0_2 = arith.constant 0 : index
    %c0_3 = arith.constant 0 : index
    %c0_4 = arith.constant 0 : index
    %2 = vector.load %arg2[%c0_2, %c0_3, %c0_4] : memref<5x32x32xf32, #tpu.memory_space<vmem>>, vector<5x32x32xf32>
    %cst = arith.constant 0.000000e+00 : f32
    %3 = vector.broadcast %cst : f32 to vector<8x32xf32>
    %4 = vector.extract_strided_slice %1 {offsets = [0, 0], sizes = [8, 32], strides = [1, 1]} : vector<12x32xf32> to vector<8x32xf32>
    %5 = vector.extract_strided_slice %2 {offsets = [0, 0, 0], sizes = [1, 32, 32], strides = [1, 1, 1]} : vector<5x32x32xf32> to vector<1x32x32xf32>
    %6 = vector.shape_cast %5 : vector<1x32x32xf32> to vector<32x32xf32>
    %cst_5 = arith.constant dense<0.000000e+00> : vector<8x32xf32>
    %7 = tpu.matmul %4, %6, %cst_5 {dimension_numbers = #tpu.dot_dimension_numbers<[1], [0], [0], [1], [0, 0, 1, 1], [], []>} : vector<8x32xf32>, vector<32x32xf32>, vector<8x32xf32> -> vector<8x32xf32>
    %8 = arith.addf %3, %7 : vector<8x32xf32>
    %9 = vector.extract_strided_slice %1 {offsets = [1, 0], sizes = [8, 32], strides = [1, 1]} : vector<12x32xf32> to vector<8x32xf32>
    %10 = vector.extract_strided_slice %2 {offsets = [1, 0, 0], sizes = [1, 32, 32], strides = [1, 1, 1]} : vector<5x32x32xf32> to vector<1x32x32xf32>
    %11 = vector.shape_cast %10 : vector<1x32x32xf32> to vector<32x32xf32>
    %cst_6 = arith.constant dense<0.000000e+00> : vector<8x32xf32>
    %12 = tpu.matmul %9, %11, %cst_6 {dimension_numbers = #tpu.dot_dimension_numbers<[1], [0], [0], [1], [0, 0, 1, 1], [], []>} : vector<8x32xf32>, vector<32x32xf32>, vector<8x32xf32> -> vector<8x32xf32>
    %13 = arith.addf %8, %12 : vector<8x32xf32>
    %14 = vector.extract_strided_slice %1 {offsets = [2, 0], sizes = [8, 32], strides = [1, 1]} : vector<12x32xf32> to vector<8x32xf32>
    %15 = vector.extract_strided_slice %2 {offsets = [2, 0, 0], sizes = [1, 32, 32], strides = [1, 1, 1]} : vector<5x32x32xf32> to vector<1x32x32xf32>
    %16 = vector.shape_cast %15 : vector<1x32x32xf32> to vector<32x32xf32>
    %cst_7 = arith.constant dense<0.000000e+00> : vector<8x32xf32>
    %17 = tpu.matmul %14, %16, %cst_7 {dimension_numbers = #tpu.dot_dimension_numbers<[1], [0], [0], [1], [0, 0, 1, 1], [], []>} : vector<8x32xf32>, vector<32x32xf32>, vector<8x32xf32> -> vector<8x32xf32>
    %18 = arith.addf %13, %17 : vector<8x32xf32>
    %19 = vector.extract_strided_slice %1 {offsets = [3, 0], sizes = [8, 32], strides = [1, 1]} : vector<12x32xf32> to vector<8x32xf32>
    %20 = vector.extract_strided_slice %2 {offsets = [3, 0, 0], sizes = [1, 32, 32], strides = [1, 1, 1]} : vector<5x32x32xf32> to vector<1x32x32xf32>
    %21 = vector.shape_cast %20 : vector<1x32x32xf32> to vector<32x32xf32>
    %cst_8 = arith.constant dense<0.000000e+00> : vector<8x32xf32>
    %22 = tpu.matmul %19, %21, %cst_8 {dimension_numbers = #tpu.dot_dimension_numbers<[1], [0], [0], [1], [0, 0, 1, 1], [], []>} : vector<8x32xf32>, vector<32x32xf32>, vector<8x32xf32> -> vector<8x32xf32>
    %23 = arith.addf %18, %22 : vector<8x32xf32>
    %24 = vector.extract_strided_slice %1 {offsets = [4, 0], sizes = [8, 32], strides = [1, 1]} : vector<12x32xf32> to vector<8x32xf32>
    %25 = vector.extract_strided_slice %2 {offsets = [4, 0, 0], sizes = [1, 32, 32], strides = [1, 1, 1]} : vector<5x32x32xf32> to vector<1x32x32xf32>
    %26 = vector.shape_cast %25 : vector<1x32x32xf32> to vector<32x32xf32>
    %cst_9 = arith.constant dense<0.000000e+00> : vector<8x32xf32>
    %27 = tpu.matmul %24, %26, %cst_9 {dimension_numbers = #tpu.dot_dimension_numbers<[1], [0], [0], [1], [0, 0, 1, 1], [], []>} : vector<8x32xf32>, vector<32x32xf32>, vector<8x32xf32> -> vector<8x32xf32>
    %28 = arith.addf %23, %27 : vector<8x32xf32>
    %c0_10 = arith.constant 0 : index
    %c0_11 = arith.constant 0 : index
    %29 = vector.load %arg3[%c0_10, %c0_11] : memref<1x32xf32, #tpu.memory_space<vmem>>, vector<1x32xf32>
    %30 = vector.broadcast %29 : vector<1x32xf32> to vector<8x32xf32>
    %31 = arith.addf %28, %30 : vector<8x32xf32>
    %cst_12 = arith.constant 0.000000e+00 : f32
    %32 = vector.broadcast %cst_12 : f32 to vector<8x32xf32>
    %33 = arith.maximumf %31, %32 : vector<8x32xf32>
    %c0_13 = arith.constant 0 : index
    %c0_14 = arith.constant 0 : index
    %34 = vector.load %arg4[%c0_13, %c0_14] : memref<8x1xf32, #tpu.memory_space<vmem>>, vector<8x1xf32>
    %35 = vector.broadcast %34 : vector<8x1xf32> to vector<8x32xf32>
    %36 = arith.mulf %33, %35 : vector<8x32xf32>
    %c0_15 = arith.constant 0 : index
    %c0_16 = arith.constant 0 : index
    %c0_17 = arith.constant 0 : index
    %37 = vector.load %arg5[%c0_15, %c0_16, %c0_17] : memref<1x8x32xf32, #tpu.memory_space<vmem>>, vector<1x8x32xf32>
    %38 = vector.shape_cast %37 : vector<1x8x32xf32> to vector<8x32xf32>
    %39 = vector.shape_cast %36 : vector<8x32xf32> to vector<1x8x32xf32>
    tpu.vector_store %arg5[%c0_15, %c0_16, %c0_17], %39 {strides = array<i32>} : memref<1x8x32xf32, #tpu.memory_space<vmem>>, vector<1x8x32xf32>,
    return
  }
  func.func @transform_0(%arg0: i32) -> (i32, i32, i32) {
    %c0_i32 = arith.constant 0 : i32
    %c0_i32_0 = arith.constant 0 : i32
    %c0_i32_1 = arith.constant 0 : i32
    return %arg0, %c0_i32, %c0_i32_0 : i32, i32, i32
  }
  func.func @transform_1(%arg0: i32) -> (i32, i32, i32) {
    %c0_i32 = arith.constant 0 : i32
    %c0_i32_0 = arith.constant 0 : i32
    %c0_i32_1 = arith.constant 0 : i32
    %c0_i32_2 = arith.constant 0 : i32
    return %c0_i32, %c0_i32_0, %c0_i32_1 : i32, i32, i32
  }
  func.func @transform_2(%arg0: i32) -> (i32, i32) {
    %c0_i32 = arith.constant 0 : i32
    %c0_i32_0 = arith.constant 0 : i32
    %c0_i32_1 = arith.constant 0 : i32
    return %c0_i32, %c0_i32_0 : i32, i32
  }
  func.func @transform_3(%arg0: i32) -> (i32, i32) {
    %c0_i32 = arith.constant 0 : i32
    %c0_i32_0 = arith.constant 0 : i32
    %c0_i32_1 = arith.constant 0 : i32
    return %c0_i32, %c0_i32_0 : i32, i32
  }
  func.func @transform_4(%arg0: i32) -> (i32, i32, i32) {
    %c0_i32 = arith.constant 0 : i32
    %c0_i32_0 = arith.constant 0 : i32
    %c0_i32_1 = arith.constant 0 : i32
    return %arg0, %c0_i32, %c0_i32_0 : i32, i32, i32
  }
}

</mosaic_0001>

<bundles_post_ra>
// kernel: tpu_custom_call.1
= control target key start
LH: loop header
LB: loop body
LE: loop exit
PB: predicated region body
PF: predicated region fallthrough
CT: control target
= control target key end

     0   :  { %9 = vsyncpa [#allocation3], 0  ;;  %s1213_s0 = inlined_call_operand.vmem [shape: f32[2,12,32], index: 0, kind: input, shape index: {}]   ;;  %s1214_s1 = inlined_call_operand.hbm [shape: f32[5,32,32], index: 1, kind: input, shape index: {}]   ;;  %s1215_s2 = inlined_call_operand.vmem [shape: f32[1,32], index: 2, kind: input, shape index: {}]   ;;  %s1216_s3 = inlined_call_operand.vmem [shape: f32[8,1], index: 3, kind: input, shape index: {}]   ;;  %s1217_s4 = inlined_call_operand.hbm [shape: f32[2,8,32], index: 4, kind: output, shape index: {}]  }
   0x1   :  { %10 = vsyncpa [#allocation4], 0 }
   0x2   :  { %12 = vsyncpa [#allocation4 + $0x1], 0  ;;  %s1033_s15 = smov 0   ;;  %s1035_s16 = smov 0  }
   0x3   :  { %s1037_s17 = smov 0   ;;  %s1039_s18 = smov 0  }
   0x4 LB: > { %s1054_s19 = sadd.s32 4294967295, %s998_s18   ;;  %s717_s20 = sadd.s32 4294967294, %s998_s18   ;;  %s998_s18 = sphi %s1039_s18, %s1233_s18   ;;  %s994_s17 = sphi %s1037_s17, %s1232_s17   ;;  %s990_s16 = sphi %s1035_s16, %s1231_s16   ;;  %s986_s15 = sphi %s1033_s15, %s1230_s15  }
   0x5   : > { %s1058_s21 = sadd.s32 1, %s998_s18   ;;  %s114_s22 = sadd.s32 1, %s994_s17 }
   0x6   : > { %s111_s23 = ssub.s32 %s998_s18, %s1058_s21  ;;  %p124_p0 = scmp.ne.s32.totalorder %s994_s17, %s990_s16 }
   0x7   : > { %p112_p1 = scmp.eq.s32.totalorder %s111_s23, 0  ;;  %p125_p2 = scmp.eq.s32.totalorder %s1054_s19, 1 }
   0x8   : > { %p130_p3 = scmp.ne.s32.totalorder %s990_s16, %s986_s15  ;;  %p131_p4 = scmp.eq.s32.totalorder %s717_s20, 1 }
   0x9   : > { %s1069_s24 = scalar_select %p112_p1, %s994_s17, %s114_s22  }
   0xa   : > { %p1071_p5 = por %p125_p2, %p124_p0  ;;  %p1075_p6 = por %p131_p4, %p130_p3 }
   0xb   : > { %p718_p7 = scmp.ge.s32.totalorder %s998_s18, 1  ;;  %p138_p8 = scmp.lt.s32.totalorder %s998_s18, 3 }
   0xc   : > { %s1221_s25 = scalar_select %p1071_p5, 1, 0 }
   0xd   : > { %s1222_s26 = scalar_select %p1075_p6, 1, 0 }
   0xe   : > { %p1218_p9 = scmp.eq.s32.totalorder %s1054_s19, 0  ;;  %p1082_p10 = pnand %p718_p7, %p138_p8 }
   0xf   : > { %s1000_s28 = smov [#allocation2]   ;;  %s904_s7 = scalar_lea.hbm %s1214_s1, 2560 }
  0x10   : > { %s1223_s27 = scalar_select %p1082_p10, 1, 0 }
  0x11   : > { %s150_s29 = sshll.u32 %s1000_s28, 4  ;;  %p853_p11 = pneg %p1082_p10  ;;  %s151_s29 = int_to_ptr.vmem [resolvable:$true] %s150_s29 }
  0x12   : > { %p905_p13 = scmp.ne.s32.totalorder %s1214_s1, %s904_s7  ;;  %p911_p3 = scmp.lt.u32.totalorder %s904_s7, %s1214_s1 }
  0x13   : > { %p1090_p12 = pnand %p1218_p9, %p853_p11 }
  0x15   : > { %p906_p0 = pneg %p1090_p12 }
  0x17   : > { %p907_p1 = pnand %p906_p0, %p905_p13 }
  0x19   : > { %p908_p2 = pneg %p907_p1 }
  0x1b   : > { %p913_p4 = pnand %p911_p3, %p908_p2 }
  0x1d   : > { %916 = shalt.err (!%p913_p4)
}
  0x1e   : > { %s917_s12 = scalar_lea.vmem %s151_s29, 2560  ;;  %p925_p9 = scmp.lt.s32.totalorder %s151_s29, %s151_s29 }
  0x1f   : > { %p918_p7 = scmp.ne.s32.totalorder %s151_s29, %s917_s12  ;;  %p926_p6 = scmp.lt.s32.totalorder %s917_s12, %s917_s12 }
  0x21   : > { %p920_p8 = pnand %p918_p7, %p906_p0  ;;  %p927_p5 = por %p926_p6, %p925_p9 }
  0x23   : > { %p921_p11 = pneg %p920_p8 }
  0x25   : > { %p928_p10 = pnand %p927_p5, %p921_p11 }
  0x27   : > { %931 = shalt.err (!%p928_p10)
}
  0x28   : > { %s1001_s13 = smov 128   ;;  %s1002_s14 = smov 8  }
  0x29   : > { %856 = dma.hbm_to_vmem [thread:$0]  (!%p1090_p12), %s1214_s1, 2560, %s151_s29, [#allocation3], %s1001_s13, %s1001_s13, %s1002_s14  }
  0x2a   : > { %p1225_p13 = scmp.ne.s32.totalorder %s1223_s27, 0 }
  0x2b   : > { %p1226_p1 = scmp.eq.s32.totalorder (!%p1225_p13), %s1054_s19, 0 }
  0x2c   : > { %180 = sbr.rel (%p1225_p13) target bundleno = 313 (0x139), region = 36 }
  0x33   : > { %977 = dma.done.wait (%p1226_p1), [#allocation3], 2560   ;;  %p1227_p0 = pmov %p1226_p1 }
  0x34   : > { %p206_p5 = scmp.lt.s32.totalorder %s1054_s19, 1  ;;  %v1003_v0 = vmov 0.0|0.0   ;;  %vm1004_vm0 = vmmov 0   ;;  %v1005_v1 = vmov 0.0   ;;  %v1006_v2 = vmov 0   ;;  %v217_v3 = vld [vmem:[#allocation2 + $0x20] sm:$0xff] }
  0x35   : > { %979 = vsyncadd (%p1227_p0), [#allocation3], 4294964736  ;;  %817 = vmatprep.subr.bf16.mxu0 %v1003_v0  ;;  %823 = vmatprep.subr.bf16.mxu1 %v1003_v0  ;;  %v218_v4 = vld [vmem:[#allocation2 + $0x28] sm:$0xff]  ;;  %v213_v5 = vld [vmem:[#allocation2] sm:$0xff]  ;;  %vm235_vm1 = vcmask 1046528   ;;  %vm239_vm2 = vcmask 261120  }
  0x36   : > { %770 = vmatprep.mubr.msk.f32.mxu0 %vm1004_vm0, %v1005_v1  ;;  %s207_s23 = scalar_select %p206_p5, %s1054_s19, 1  ;;  %781 = vmatprep.mubr.msk.f32.mxu1 %vm1004_vm0, %v1005_v1  ;;  %v818_v6 = vpack.c.bf16 %v218_v4, %v217_v3  ;;  %v214_v7 = vld [vmem:[#allocation2 + $0x8] sm:$0xff]  ;;  %v219_v8 = vld [vmem:[#allocation2 + $0x30] sm:$0xff]  ;;  %v220_v9 = vld [vmem:[#allocation2 + $0x38] sm:$0xff]  ;;  %vm384_vm3 = vcmask 1045504   ;;  %vm461_vm4 = vcmask 1044480  }
  0x37   : > { %903 = vset.pattern.permute.xlu0 %v1006_v2  ;;  %v824_v10 = vpack.c.bf16 %v214_v7, %v213_v5  ;;  %v215_v11 = vld [vmem:[#allocation2 + $0x10] sm:$0xff]  ;;  %v216_v12 = vld [vmem:[#allocation2 + $0x18] sm:$0xff]  ;;  %v821_v14 = vpack.c.bf16 %v220_v9, %v219_v8  ;;  %v221_v19 = vld [vmem:[#allocation2 + $0x40] sm:$0xff]  ;;  %vm538_vm5 = vcmask 1043456   ;;  %s203_s7 = sand.u32 1, %s990_s16   ;;  %s733_s11 = sshll.u32 %s1054_s19, 7 }
  0x38   : > { %s736_s27 = sshll.u32 %s207_s23, 4  ;;  %819 = vmatpush3.bf16.msra.mxu0 %v818_v6  ;;  %v827_v17 = vpack.c.bf16 %v216_v12, %v215_v11  ;;  %v222_v20 = vld [vmem:[#allocation2 + $0x48] sm:$0xff]  ;;  %v225_v21 = vld [vmem:[#allocation2 + $0x60] sm:$0xff]  ;;  %v223_v27 = vld [vmem:[#allocation2 + $0x50] sm:$0xff]  ;;  %s723_s8 = sshll.u32 %s203_s7, 3 }
  0x39   : > { %s210_s30 = scalar_lea.vmem %s1213_s0, %s736_s27  ;;  %825 = vmatpush3.bf16.msra.mxu1 %v824_v10  ;;  %820 = vmatprep.subr.bf16.mxu0 %v1003_v0  ;;  %v226_v22 = vld [vmem:[#allocation2 + $0x68] sm:$0xff]  ;;  %v830_v24 = vpack.c.bf16 %v222_v20, %v221_v19  ;;  %v624_v25 = vld [vmem:[%s1216_s3] sm:$0xff]  ;;  %v224_v28 = vld [vmem:[#allocation2 + $0x58] sm:$0xff]  ;;  %s205_s12 = scalar_lea.vmem [#allocation5], %s723_s8 }
  0x3a   : > { %v1127_v13 = vld [vmem:[%s210_s30] sm:$0xff]  ;;  %v1129_v15 = vld [vmem:[%s210_s30 + $0x8] sm:$0xf]  ;;  %826 = vmatprep.subr.bf16.mxu1 %v1003_v0  ;;  %v836_v26 = vpack.c.bf16 %v226_v22, %v225_v21  ;;  %v227_v29 = vld [vmem:[#allocation2 + $0x70] sm:$0xff]  ;;  %627 = vperm.xlu0 %903, %v624_v25   ;;  %v833_v31 = vpack.c.bf16 %v224_v28, %v223_v27  ;;  %s646_s13 = sshll.u32 %s205_s12, 4  ;;  %s1170_s22 = scalar_lea.hbm %s1217_s4, %s733_s11  ;;  %s1172_s13 = int_to_ptr.vmem [resolvable:$true] %s646_s13 }
  0x3b   : > { %v236_v16 = vrot.slane %v1127_v13, 1  ;;  %v237_v18 = vrot.slane %v1129_v15, 1  ;;  %v228_v30 = vld [vmem:[#allocation2 + $0x78] sm:$0xff]  ;;  %v385_v32 = vrot.slane %v1127_v13, 2  ;;  %v386_v33 = vrot.slane %v1129_v15, 2  ;;  %v229_v35 = vld [vmem:[#allocation2 + $0x80] sm:$0xff] }
  0x3c   : > { %822 = vmatpush3.bf16.msra.mxu0 %v821_v14  ;;  %v839_v34 = vpack.c.bf16 %v228_v30, %v227_v29  ;;  %v230_v36 = vld [vmem:[#allocation2 + $0x88] sm:$0xff]  ;;  %v462_v37 = vrot.slane %v1127_v13, 3  ;;  %v463_v38 = vrot.slane %v1129_v15, 3  ;;  %v231_v42 = vld [vmem:[#allocation2 + $0x90] sm:$0xff]  ;;  %v232_v43 = vld [vmem:[#allocation2 + $0x98] sm:$0xff]  ;;  %v539_v45 = vrot.slane %v1127_v13, 4 }
  0x3d   : > { %v238_v23 = vsel %vm235_vm1, %v236_v16, %v237_v18  ;;  %828 = vmatpush3.bf16.msra.mxu1 %v827_v17  ;;  %829 = vmatprep.subr.bf16.mxu0 %v1003_v0  ;;  %v387_v39 = vsel %vm384_vm3, %v385_v32, %v386_v33  ;;  %v842_v40 = vpack.c.bf16 %v230_v36, %v229_v35  ;;  %v540_v46 = vrot.slane %v1129_v15, 4  ;;  %v731_v60 = vld [vmem:[%s1215_s2] ss:$0 sm:$0xff]  ;;  %s633_s23 = scalar_lea.sflag [#allocation4], %s203_s7  ;;  %s932_s27 = scalar_lea.vmem %s1172_s13, 128 }
  0x3e   : > { %835 = vmatprep.subr.bf16.mxu1 %v1003_v0  ;;  %v464_v41 = vsel %vm461_vm4, %v462_v37, %v463_v38  ;;  %v845_v44 = vpack.c.bf16 %v232_v43, %v231_v42  ;;  %p933_p6 = scmp.ne.s32.totalorder %s1172_s13, %s932_s27  ;;  %p1228_p9 = scmp.ne.s32.totalorder %s1221_s25, 0 }
  0x3f   : > { %771 = vmatmul.mubr.msk.f32.vlgmr.msra.gmra.mrb[0].mxu0 %vm239_vm2, %v238_v23  ;;  %v541_v47 = vsel %vm538_vm5, %v539_v45, %v540_v46  ;;  %s1007_s19 = smov [#allocation5]  }
  0x40   : > { %782 = vmatmul.mubr.msk.f32.vlgmr.msra.gmra.mrb[0].mxu1 %vm239_vm2, %v1127_v13  ;;  %831 = vmatpush3.bf16.msra.mxu0 %v830_v24  ;;  %p934_p10 = pnand %p933_p6, %p1228_p9  ;;  %s936_s28 = sshll.u32 %s1007_s19, 4  ;;  %s937_s28 = int_to_ptr.vmem [resolvable:$false] %s936_s28 }
  0x41   : > { %837 = vmatpush3.bf16.msra.mxu1 %v836_v26  ;;  %832 = vmatprep.subr.bf16.mxu0 %v1003_v0  ;;  %s938_s29 = scalar_lea.vmem %s937_s28, 256  ;;  %p939_p2 = scmp.lt.s32.totalorder %s1172_s13, %s937_s28 }
  0x42   : > { %838 = vmatprep.subr.bf16.mxu1 %v1003_v0  ;;  %792 = vmatprep.mubr.msk.f32.mxu0 %vm1004_vm0, %v1005_v1  ;;  %p935_p12 = pneg %p934_p10  ;;  %p940_p3 = scmp.lt.s32.totalorder %s938_s29, %s932_s27 }
  0x43   : > { %803 = vmatprep.mubr.msk.f32.mxu1 %vm1004_vm0, %v1005_v1 }
  0x44   : > { %834 = vmatpush3.bf16.msra.mxu0 %v833_v31  ;;  %p941_p4 = por %p940_p3, %p939_p2 }
  0x45   : > { %840 = vmatpush3.bf16.msra.mxu1 %v839_v34  ;;  %841 = vmatprep.subr.bf16.mxu0 %v1003_v0 }
  0x46   : > { %p942_p7 = pnand %p941_p4, %p935_p12 }
  0x47   : > { %793 = vmatmul.mubr.msk.f32.vlgmr.msra.gmra.mrb[2].mxu0 %vm239_vm2, %v387_v39 }
  0x48   : > { %843 = vmatpush3.bf16.msra.mxu0 %v842_v40  ;;  %804 = vmatmul.mubr.msk.f32.vlgmr.msra.gmra.mrb[2].mxu1 %vm239_vm2, %v464_v41 }
  0x49   : > { %844 = vmatprep.subr.bf16.mxu0 %v1003_v0  ;;  %814 = vmatprep.mubr.msk.f32.mxu0 %vm1004_vm0, %v1005_v1 }
  0x4c   : > { %846 = vmatpush3.bf16.msra.mxu0 %v845_v44 }
  0x4f   : > { %815 = vmatmul.mubr.msk.f32.vlgmr.msra.gmra.mrb[4].mxu0 %vm239_vm2, %v541_v47 }
  0xb9   : > { %v628_v0 = vpop.permute.xlu0 %627 }
 0x112   : > { %v308_v48 = vpop.f32.mrb[0].mxu0 }
 0x113   : > { %v772_v49 = vpop.f32.mrb[1].mxu0  ;;  %v380_v50 = vpop.f32.mrb[0].mxu1 }
 0x114   : > { %v381_v51 = vadd.f32 %v380_v50, %v308_v48  ;;  %v783_v52 = vpop.f32.mrb[1].mxu1 }
 0x11a   : > { %v456_v53 = vpop.f32.mrb[2].mxu0 }
 0x11b   : > { %v460_v54 = vadd.f32 %v456_v53, %v381_v51  ;;  %v794_v55 = vpop.f32.mrb[3].mxu0  ;;  %v533_v56 = vpop.f32.mrb[2].mxu1 }
 0x11c   : > { %v805_v57 = vpop.f32.mrb[3].mxu1 }
 0x11d   : > { %v537_v58 = vadd.f32 %v533_v56, %v460_v54 }
 0x122   : > { %v610_v59 = vpop.f32.mrb[4].mxu0 }
 0x123   : > { %v614_v61 = vadd.f32 %v610_v59, %v537_v58  ;;  %v816_v62 = vpop.f32.mrb[5].mxu0 }
 0x125   : > { %v622_v63 = vadd.f32 %v731_v60, %v614_v61 }
 0x127   : > { %v623_v1 = vmax.f32 %v622_v63, 0.0 }
 0x129   : > { %v630_v2 = vmul.f32 %v628_v0, %v623_v1 }
 0x12b   : > { %631 = vst.msk [vmem:[%s205_s12] sm:$0xff] %vm239_vm2, %v630_v2 }
 0x12c   : > { %945 = shalt.err (!%p942_p7)
}
 0x12d   : > { %s946_s30 = scalar_lea.hbm %s1170_s22, 128  ;;  %s950_s7 = scalar_lea.hbm %s1217_s4, 256 }
 0x12e   : > { %p947_p8 = scmp.ne.s32.totalorder %s1170_s22, %s946_s30  ;;  %p951_p1 = scmp.lt.u32.totalorder %s1170_s22, %s1217_s4 }
 0x12f   : > { %p952_p0 = scmp.lt.u32.totalorder %s950_s7, %s946_s30  ;;  %p954_p6 = scmp.lt.u32.totalorder %s946_s30, %s1170_s22 }
 0x130   : > { %p948_p11 = pnand %p947_p8, %p1228_p9 }
 0x131   : > { %p953_p5 = por %p952_p0, %p951_p1 }
 0x132   : > { %p949_p13 = pneg %p948_p11 }
 0x133   : > { %p955_p10 = por %p954_p6, %p953_p5 }
 0x135   : > { %p956_p12 = pnand %p955_p10, %p949_p13 }
 0x137   : > { %959 = shalt.err (!%p956_p12)
}
 0x138   : > { %851 = dma.vmem_to_hbm [thread:$0]  (%p1228_p9), %s1172_s13, 128, %s1170_s22, %s633_s23  }
 0x139 PF: > { %p863_p2 = scmp.ge.s32.totalorder %s998_s18, 2  ;;  %s658_s10 = sand.u32 1, %s986_s15  }
 0x13a   : > { %p1229_p3 = scmp.ne.s32.totalorder %s1222_s26, 0  ;;  %s659_s11 = scalar_lea.sflag [#allocation4], %s658_s10 }
 0x13c   : > { %p858_p4 = pnand %p863_p2, %p1229_p3 }
 0x13e   : > { %981 = dma.done.wait (!%p858_p4), %s659_s11, 128  }
 0x13f   : > { %983 = vsyncadd (!%p858_p4), %s659_s11, 4294967168  ;;  %p15_p7 = scmp.ge.s32.totalorder %s1058_s21, 4   ;;  %s1230_s15 = smov %s990_s16 }
 0x140   : > { %s1231_s16 = smov %s994_s17  ;;  %s1232_s17 = smov %s1069_s24 }
 0x141   : > { %s1233_s18 = smov %s1058_s21  ;;  %17 = sbr.rel (!%p15_p7) target bundleno = 4 (0x4), region = 76 }
 0x148   :  { %664 = vsyncpa [#allocation3], 1 }
 0x149   :  { %666 = vsyncpa [#allocation3 + $0x1], 1 }
 0x14a   :  { %667 = vsyncpa [#allocation4], 1 }
 0x14b   :  { %669 = vsyncpa [#allocation4 + $0x1], 1 }

</bundles_post_ra>
